<compile_context>
chip_gen: v7x
topology: tpu7x:2x2x1
jax: 0.10.0
libtpu: 0.0.40
codegen_flags: <defaults>
</compile_context>

<pallas_src>
import numpy as np
import jax
import jax.numpy as jnp
from jax.experimental import pallas as pl
from jax.experimental.pallas import tpu as pltpu


def _round_up(n, m):
    return ((n + m - 1) // m) * m


def _vmem_capacity_bytes():
    try:
        return int(pltpu.get_tpu_info().vmem_capacity_bytes)
    except Exception:
        return 64 << 20          # conservative fallback: v7x per-TensorCore VMEM


def _per_step_vmem_bytes(c_pad, c_out, tile_f):
    """Rough double-buffered VMEM footprint of one grid step."""
    in_blocks = 4 * c_pad * tile_f * 2            # self + 3 neighbor tiles, bf16
    out_block = c_out * tile_f * 2                # bf16 output tile
    consts = c_out * 5 * c_pad * 2 + c_out * 4    # fused weight (bf16) + bias (f32)
    scratch = (5 * c_pad * tile_f * 2             # bf16 K-slab
               + c_out * tile_f * 4               # f32 MXU accumulator
               + 4 * c_pad * tile_f * 4)          # f32 temps (sum/min/mid/max)
    return 2 * (in_blocks + out_block + consts) + scratch


# -----------------------------------------------------------------------------
# Pallas kernel: symmetric functions + fused (1, 5) convolution as one matmul
# -----------------------------------------------------------------------------
def meshconv_kernel(self_ref, n1_ref, n2_ref, n3_ref, w_ref, b_ref, out_ref):
    # self_ref / n*_ref: (C_pad, TILE_F) bf16, faces on the 128-lane axis
    # w_ref:             (C_out, 5*C_pad) bf16, tap-major fused Conv2d weight
    # b_ref:             (C_out, 1) f32
    # out_ref:           (C_out, TILE_F) bf16
    n1 = n1_ref[...]
    n2 = n2_ref[...]
    n3 = n3_ref[...]

    # order-invariant symmetric functions over the 3 ring neighbors.
    # min/mid/max are exact in bf16; the sum is accumulated in f32 and rounded
    # once (single bf16 rounding, matches the reference).
    s = (n1.astype(jnp.float32) + n2.astype(jnp.float32)
         + n3.astype(jnp.float32)).astype(jnp.bfloat16)            # sum
    mn = jnp.minimum(jnp.minimum(n1, n2), n3)                      # sorted[0]
    mx = jnp.maximum(jnp.maximum(n1, n2), n3)                      # sorted[2]
    mid = jnp.maximum(jnp.minimum(n1, n2),                         # sorted[1]
                      jnp.minimum(jnp.maximum(n1, n2), n3))

    # bf16 K-slab [self, sum, min, mid, max] -> one fused MXU matmul, f32 acc.
    feat = jnp.concatenate([self_ref[...], s, mn, mid, mx], axis=0)
    acc = jnp.dot(w_ref[...], feat, preferred_element_type=jnp.float32)
    out_ref[...] = (acc + b_ref[...]).astype(out_ref.dtype)


def meshconv_pallas(x_self, neigh3, w_fused, bias2d, tile_f, out_dtype):
    """x_self: (B, C_pad, F_pad) bf16; neigh3: (B, C_pad, 3*F_pad) bf16
    (tap-major columns: [n1 | n2 | n3]); w_fused: (C_out, 5*C_pad) bf16;
    bias2d: (C_out, 1) f32. Returns (B, C_out, F_pad) in out_dtype."""
    B, C_pad, F_pad = x_self.shape
    C_out = w_fused.shape[0]
    n_f = F_pad // tile_f

    per_step = _per_step_vmem_bytes(C_pad, C_out, tile_f)
    budget = int(0.6 * _vmem_capacity_bytes())       # ~38 MiB v7x, ~76 MiB v5e/v6e
    vmem_limit = int(min(max(2 * per_step, 16 << 20), budget))

    def _tap_spec(tap):
        def imap(b, f):
            return (b, 0, tap * n_f + f)
        return pl.BlockSpec((pl.Squeezed(), C_pad, tile_f), imap)

    return pl.pallas_call(
        meshconv_kernel,
        out_shape=jax.ShapeDtypeStruct((B, C_out, F_pad), out_dtype),
        grid_spec=pltpu.PrefetchScalarGridSpec(
            num_scalar_prefetch=0,
            grid=(B, n_f),
            in_specs=[
                pl.BlockSpec((pl.Squeezed(), C_pad, tile_f),
                             lambda b, f: (b, 0, f)),          # self tap
                _tap_spec(0), _tap_spec(1), _tap_spec(2),      # 3 ring neighbors
                pl.BlockSpec((C_out, 5 * C_pad), lambda b, f: (0, 0)),
                pl.BlockSpec((C_out, 1), lambda b, f: (0, 0)),
            ],
            out_specs=pl.BlockSpec((pl.Squeezed(), C_out, tile_f),
                                   lambda b, f: (b, 0, f)),
        ),
        compiler_params=pltpu.CompilerParams(
            dimension_semantics=("parallel", "parallel"),
            vmem_limit_bytes=vmem_limit,
        ),
    )(x_self, neigh3, neigh3, neigh3, w_fused, bias2d)


# -----------------------------------------------------------------------------
# Glue (plain JAX): pad_gemm / create_GeMM gather, parameter setup, NCHW I/O
# -----------------------------------------------------------------------------
def pad_gemm_int(gemm_faces, faces_count, xsz):
    """(xsz, 4) int32 index table: [face_id, 3 ring neighbors], zero-padded.
    NOTE: rows are zero-padded BEFORE the +1 shift applied by the caller,
    exactly mirroring the PyTorch module (pad_gemm pads with 0; create_GeMM
    then adds 1), so rows >= faces_count reference face 0."""
    g = jnp.asarray(np.asarray(gemm_faces), dtype=jnp.int32)             # (nf, 3)
    ids = jnp.arange(faces_count, dtype=jnp.int32)[:, None]              # (nf, 1)
    tbl = jnp.concatenate([ids, g], axis=1)                              # (nf, 4)
    return jnp.pad(tbl, ((0, xsz - faces_count), (0, 0)))                # (xsz, 4)


def mesh_conv_forward(x, meshes, weight, bias, tile_f=1024, out_dtype=jnp.bfloat16):
    """x: (B, C_in, F, 1); weight: (C_out, C_in, 1, 5); bias: (C_out,).
    Returns (B, C_out, F, 1) in out_dtype (bf16 by default)."""
    x = jnp.squeeze(x, axis=-1)                                          # (B, C, F)
    B, C, F = x.shape
    C_out = weight.shape[0]

    # ---- face tile sizing: multiple of 128 lanes, VMEM-budgeted; when B == 1,
    #      expose >= 2 face tiles so v7x's two TensorCores both get work.
    C_pad = _round_up(C, 16)                      # bf16 sublane packing
    f128 = _round_up(F, 128)
    tile_f = max(128, min(_round_up(tile_f, 128), f128))
    if B == 1 and f128 > 128:
        tile_f = min(tile_f, _round_up(-(-F // 2), 128))
    budget = int(0.6 * _vmem_capacity_bytes())
    while tile_f > 128 and _per_step_vmem_bytes(C_pad, C_out, tile_f) > budget:
        tile_f -= 128
    F_pad = _round_up(F, tile_f)
    assert F_pad % tile_f == 0

    # ---- int32 index table (spec semantics: zero-pad, then +1 in create_GeMM)
    G = jnp.stack([pad_gemm_int(m["gemm_faces"], m["faces_count"], F)
                   for m in meshes], axis=0)                             # (B, F, 4)
    idx = G + 1                                                          # row 0 of xp = zero pad
    nbr = jnp.transpose(idx[:, :, 1:4], (0, 2, 1))                       # (B, 3, F)
    nbr = jnp.pad(nbr, ((0, 0), (0, 0), (0, F_pad - F)))                 # tile pad -> zero row
    nbr = nbr.reshape(B, 3 * F_pad)                                      # tap-major columns

    # ---- gather source: zero padding row + channel-padded features (bf16)
    xp = jnp.concatenate([jnp.zeros((B, C, 1), x.dtype), x], axis=2)     # (B, C, F+1)
    xp = jnp.pad(xp, ((0, 0), (0, C_pad - C), (0, 0))).astype(jnp.bfloat16)

    # Single lane-dense gather of the 3 ring neighbors, landing directly in the
    # kernel's tap-major faces-on-lanes layout: no 4x tensor, no post-transpose.
    neigh3 = jax.vmap(lambda xb, ib: jnp.take(xb, ib, axis=1))(xp, nbr)  # (B, C_pad, 3*F_pad)

    # ---- self tap straight from x; rows >= faces_count use face 0 (spec).
    fc = jnp.asarray([int(m["faces_count"]) for m in meshes], jnp.int32)
    col = jnp.arange(F, dtype=jnp.int32)
    valid = col[None, :] < fc[:, None]                                   # (B, F)
    x_fix = jnp.where(valid[:, None, :], x, x[:, :, 0:1])                # (B, C, F)
    x_self = jnp.pad(x_fix, ((0, 0), (0, C_pad - C), (0, F_pad - F))
                     ).astype(jnp.bfloat16)                              # (B, C_pad, F_pad)

    # ---- Conv2d weight (C_out, C_in, 1, 5) -> fused (C_out, 5*C_pad), tap-major
    w = jnp.pad(weight[:, :, 0, :], ((0, 0), (0, C_pad - C), (0, 0)))    # (C_out, C_pad, 5)
    w_fused = jnp.transpose(w, (0, 2, 1)).reshape(C_out, 5 * C_pad)
    w_fused = w_fused.astype(jnp.bfloat16)
    bias2d = bias[:, None].astype(jnp.float32)                           # (C_out, 1)

    out = meshconv_pallas(x_self, neigh3, w_fused, bias2d, tile_f, out_dtype)
    return out[:, :, :F][..., None]                                      # (B, C_out, F, 1)


def reference_forward(x, meshes, weight, bias):
    """Pure-JAX reference mirroring the PyTorch module semantics, with the same
    bf16 quantization points (features, weights, output) as the kernel path."""
    x = jnp.squeeze(x, axis=-1)
    B, C, F = x.shape
    G = jnp.stack([pad_gemm_int(m["gemm_faces"], m["faces_count"], F)
                   for m in meshes], axis=0)                             # (B, F, 4)
    xp = jnp.concatenate([jnp.zeros((B, C, 1), x.dtype), x], axis=2)
    xp = xp.astype(jnp.bfloat16)
    idx = G + 1
    g = jax.vmap(lambda xb, ib: jnp.take(xb, ib, axis=1))(xp, idx)       # (B, C, F, 4) bf16
    nbrs = g[..., 1:4]
    s = nbrs.astype(jnp.float32).sum(-1).astype(jnp.bfloat16)            # (B, C, F)
    srt = jnp.sort(nbrs, axis=-1)
    feat = jnp.stack([g[..., 0], s, srt[..., 0], srt[..., 1], srt[..., 2]],
                     axis=-1).astype(jnp.float32)                        # (B, C, F, 5)
    w = weight[:, :, 0, :].astype(jnp.bfloat16).astype(jnp.float32)      # (C_out, C, 5)
    out = jnp.einsum("bcfj,ocj->bof", feat, w,
                     precision=jax.lax.Precision.HIGHEST) + bias[None, :, None]
    return out.astype(jnp.bfloat16)[..., None]                           # (B, C_out, F, 1)


# -----------------------------------------------------------------------------
if __name__ == "__main__":
    B, C_in, C_out, F, K = 2, 4, 8, 16, 5

    key = jax.random.PRNGKey(0)
    k_x, k_w, k_b, k_g0, k_g1 = jax.random.split(key, 5)

    # face features, NCHW-ish: (B, C_in, Faces, 1)
    x = jax.random.normal(k_x, (B, C_in, F, 1), dtype=jnp.float32)

    # deterministic Conv2d parameters: weight (C_out, C_in, 1, K), bias (C_out,)
    weight = jax.random.normal(k_w, (C_out, C_in, 1, K), dtype=jnp.float32) * 0.1
    bias = jax.random.normal(k_b, (C_out,), dtype=jnp.float32) * 0.1

    # synthetic mesh data-structures: gemm_faces (#faces x 3) ring-neighbor ids
    meshes = [
        {"gemm_faces": np.array(jax.random.randint(k_g0, (F, 3), 0, F)),
         "faces_count": F},
        {"gemm_faces": np.array(jax.random.randint(k_g1, (F, 3), 0, F)),
         "faces_count": F},
    ]

    out = jax.block_until_ready(mesh_conv_forward(x, meshes, weight, bias))
    ref = jax.block_until_ready(reference_forward(x, meshes, weight, bias))

    assert out.shape == (B, C_out, F, 1), out.shape
    np.testing.assert_allclose(np.asarray(out).astype(np.float32),
                               np.asarray(ref).astype(np.float32),
                               rtol=2e-2, atol=2e-3)

    print("KERNEL_OK")
</pallas_src>

<mosaic_0001>
module attributes {stable_mosaic.version = 11 : i64} {
  func.func @meshconv_kernel(%arg0: i32, %arg1: i32, %arg2: memref<1x16x128xbf16, #tpu.memory_space<vmem>>, %arg3: memref<1x16x128xbf16, #tpu.memory_space<vmem>>, %arg4: memref<1x16x128xbf16, #tpu.memory_space<vmem>>, %arg5: memref<1x16x128xbf16, #tpu.memory_space<vmem>>, %arg6: memref<8x80xbf16, #tpu.memory_space<vmem>>, %arg7: memref<8x1xf32, #tpu.memory_space<vmem>>, %arg8: memref<1x8x128xbf16, #tpu.memory_space<vmem>>) attributes {dimension_semantics = [#tpu.dimension_semantics<parallel>, #tpu.dimension_semantics<parallel>], iteration_bounds = array<i64: 2, 1>, scalar_prefetch = 0 : i64, scratch_operands = 0 : i64, tpu.core_type = #tpu.core_type<tc>, window_params = [{transform_indices = @transform_0, window_bounds = array<i64: 1, 16, 128>}, {transform_indices = @transform_1, window_bounds = array<i64: 1, 16, 128>}, {transform_indices = @transform_2, window_bounds = array<i64: 1, 16, 128>}, {transform_indices = @transform_3, window_bounds = array<i64: 1, 16, 128>}, {pipeline_mode = #tpu.pipeline_mode<synchronous>, transform_indices = @transform_4, window_bounds = array<i64: 8, 80>}, {pipeline_mode = #tpu.pipeline_mode<synchronous>, transform_indices = @transform_5, window_bounds = array<i64: 8, 1>}, {transform_indices = @transform_6, window_bounds = array<i64: 1, 8, 128>}]} {
    %c0 = arith.constant 0 : index
    %c0_0 = arith.constant 0 : index
    %c0_1 = arith.constant 0 : index
    %0 = vector.load %arg3[%c0, %c0_0, %c0_1] : memref<1x16x128xbf16, #tpu.memory_space<vmem>>, vector<1x16x128xbf16>
    %1 = vector.shape_cast %0 : vector<1x16x128xbf16> to vector<16x128xbf16>
    %c0_2 = arith.constant 0 : index
    %c0_3 = arith.constant 0 : index
    %c0_4 = arith.constant 0 : index
    %2 = vector.load %arg4[%c0_2, %c0_3, %c0_4] : memref<1x16x128xbf16, #tpu.memory_space<vmem>>, vector<1x16x128xbf16>
    %3 = vector.shape_cast %2 : vector<1x16x128xbf16> to vector<16x128xbf16>
    %c0_5 = arith.constant 0 : index
    %c0_6 = arith.constant 0 : index
    %c0_7 = arith.constant 0 : index
    %4 = vector.load %arg5[%c0_5, %c0_6, %c0_7] : memref<1x16x128xbf16, #tpu.memory_space<vmem>>, vector<1x16x128xbf16>
    %5 = vector.shape_cast %4 : vector<1x16x128xbf16> to vector<16x128xbf16>
    %6 = arith.extf %1 : vector<16x128xbf16> to vector<16x128xf32>
    %7 = arith.extf %3 : vector<16x128xbf16> to vector<16x128xf32>
    %8 = arith.addf %6, %7 : vector<16x128xf32>
    %9 = arith.extf %5 : vector<16x128xbf16> to vector<16x128xf32>
    %10 = arith.addf %8, %9 : vector<16x128xf32>
    %11 = arith.truncf %10 : vector<16x128xf32> to vector<16x128xbf16>
    %12 = arith.minimumf %1, %3 : vector<16x128xbf16>
    %13 = arith.minimumf %12, %5 : vector<16x128xbf16>
    %14 = arith.maximumf %1, %3 : vector<16x128xbf16>
    %15 = arith.maximumf %14, %5 : vector<16x128xbf16>
    %16 = arith.minimumf %1, %3 : vector<16x128xbf16>
    %17 = arith.maximumf %1, %3 : vector<16x128xbf16>
    %18 = arith.minimumf %17, %5 : vector<16x128xbf16>
    %19 = arith.maximumf %16, %18 : vector<16x128xbf16>
    %c0_8 = arith.constant 0 : index
    %c0_9 = arith.constant 0 : index
    %c0_10 = arith.constant 0 : index
    %20 = vector.load %arg2[%c0_8, %c0_9, %c0_10] : memref<1x16x128xbf16, #tpu.memory_space<vmem>>, vector<1x16x128xbf16>
    %21 = vector.shape_cast %20 : vector<1x16x128xbf16> to vector<16x128xbf16>
    %22 = tpu.concatenate %21, %11, %13, %19, %15 in 0 : vector<16x128xbf16>, vector<16x128xbf16>, vector<16x128xbf16>, vector<16x128xbf16>, vector<16x128xbf16> -> vector<80x128xbf16>
    %c0_11 = arith.constant 0 : index
    %c0_12 = arith.constant 0 : index
    %23 = vector.load %arg6[%c0_11, %c0_12] : memref<8x80xbf16, #tpu.memory_space<vmem>>, vector<8x80xbf16>
    %cst = arith.constant dense<0.000000e+00> : vector<8x128xf32>
    %24 = tpu.matmul %23, %22, %cst {dimension_numbers = #tpu.dot_dimension_numbers<[1], [0], [0], [1], [0, 0, 1, 1], [], []>} : vector<8x80xbf16>, vector<80x128xbf16>, vector<8x128xf32> -> vector<8x128xf32>
    %c0_13 = arith.constant 0 : index
    %c0_14 = arith.constant 0 : index
    %25 = vector.load %arg7[%c0_13, %c0_14] : memref<8x1xf32, #tpu.memory_space<vmem>>, vector<8x1xf32>
    %26 = vector.broadcast %25 : vector<8x1xf32> to vector<8x128xf32>
    %27 = arith.addf %24, %26 : vector<8x128xf32>
    %28 = arith.truncf %27 : vector<8x128xf32> to vector<8x128xbf16>
    %c0_15 = arith.constant 0 : index
    %c0_16 = arith.constant 0 : index
    %c0_17 = arith.constant 0 : index
    %29 = vector.load %arg8[%c0_15, %c0_16, %c0_17] : memref<1x8x128xbf16, #tpu.memory_space<vmem>>, vector<1x8x128xbf16>
    %30 = vector.shape_cast %29 : vector<1x8x128xbf16> to vector<8x128xbf16>
    %31 = vector.shape_cast %28 : vector<8x128xbf16> to vector<1x8x128xbf16>
    tpu.vector_store %arg8[%c0_15, %c0_16, %c0_17], %31 {strides = array<i32>} : memref<1x8x128xbf16, #tpu.memory_space<vmem>>, vector<1x8x128xbf16>,
    return
  }
  func.func @transform_0(%arg0: i32, %arg1: i32) -> (i32, i32, i32) {
    %c0_i32 = arith.constant 0 : i32
    %c0_i32_0 = arith.constant 0 : i32
    return %arg0, %c0_i32, %arg1 : i32, i32, i32
  }
  func.func @transform_1(%arg0: i32, %arg1: i32) -> (i32, i32, i32) {
    %c0_i32 = arith.constant 0 : i32
    %0 = arith.addi %c0_i32, %arg1 : i32
    %c0_i32_0 = arith.constant 0 : i32
    %c0_i32_1 = arith.constant 0 : i32
    return %arg0, %c0_i32_0, %0 : i32, i32, i32
  }
  func.func @transform_2(%arg0: i32, %arg1: i32) -> (i32, i32, i32) {
    %c1_i32 = arith.constant 1 : i32
    %0 = arith.addi %c1_i32, %arg1 : i32
    %c0_i32 = arith.constant 0 : i32
    %c0_i32_0 = arith.constant 0 : i32
    return %arg0, %c0_i32, %0 : i32, i32, i32
  }
  func.func @transform_3(%arg0: i32, %arg1: i32) -> (i32, i32, i32) {
    %c2_i32 = arith.constant 2 : i32
    %0 = arith.addi %c2_i32, %arg1 : i32
    %c0_i32 = arith.constant 0 : i32
    %c0_i32_0 = arith.constant 0 : i32
    return %arg0, %c0_i32, %0 : i32, i32, i32
  }
  func.func @transform_4(%arg0: i32, %arg1: i32) -> (i32, i32) {
    %c0_i32 = arith.constant 0 : i32
    %c0_i32_0 = arith.constant 0 : i32
    %c0_i32_1 = arith.constant 0 : i32
    return %c0_i32, %c0_i32_0 : i32, i32
  }
  func.func @transform_5(%arg0: i32, %arg1: i32) -> (i32, i32) {
    %c0_i32 = arith.constant 0 : i32
    %c0_i32_0 = arith.constant 0 : i32
    %c0_i32_1 = arith.constant 0 : i32
    return %c0_i32, %c0_i32_0 : i32, i32
  }
  func.func @transform_6(%arg0: i32, %arg1: i32) -> (i32, i32, i32) {
    %c0_i32 = arith.constant 0 : i32
    %c0_i32_0 = arith.constant 0 : i32
    return %arg0, %c0_i32, %arg1 : i32, i32, i32
  }
}

</mosaic_0001>

<bundles_post_ra>
// kernel: tpu_custom_call.1
= control target key start
LH: loop header
LB: loop body
LE: loop exit
PB: predicated region body
PF: predicated region fallthrough
CT: control target
= control target key end

     0   :  { %s1414_s0 = inlined_call_operand.hbm [shape: bf16[2,16,128], index: 0, kind: input, shape index: {}]   ;;  %s1415_s1 = inlined_call_operand.hbm [shape: bf16[2,16,384], index: 1, kind: input, shape index: {}]   ;;  %s1416_s2 = inlined_call_operand.hbm [shape: bf16[2,16,384], index: 2, kind: input, shape index: {}]   ;;  %s1417_s3 = inlined_call_operand.hbm [shape: bf16[2,16,384], index: 3, kind: input, shape index: {}]   ;;  %s1418_s4 = inlined_call_operand.vmem [shape: bf16[8,80], index: 4, kind: input, shape index: {}]   ;;  %s1419_s5 = inlined_call_operand.vmem [shape: f32[8,1], index: 5, kind: input, shape index: {}]   ;;  %s1420_s6 = inlined_call_operand.hbm [shape: bf16[2,8,128], index: 6, kind: output, shape index: {}]  }
   0x1   :  { %1434 = sst [smem:[#allocation21_spill]] %s1414_s0 }
   0x2   :  { %1435 = sst [smem:[#allocation22_spill]] %s1415_s1 }
   0x3   :  { %11 = vsyncpa [#allocation3], 0 }
   0x4   :  { %13 = vsyncpa [#allocation3 + $0x1], 0 }
   0x5   :  { %14 = vsyncpa [#allocation6], 0 }
   0x6   :  { %16 = vsyncpa [#allocation6 + $0x1], 0 }
   0x7   :  { %17 = vsyncpa [#allocation9], 0 }
   0x8   :  { %19 = vsyncpa [#allocation9 + $0x1], 0 }
   0x9   :  { %20 = vsyncpa [#allocation4], 0 }
   0xa   :  { %22 = vsyncpa [#allocation4 + $0x1], 0  ;;  %s1095_s21 = smov 0   ;;  %s1097_s22 = smov 0  }
   0xb   :  { %s1099_s23 = smov 0   ;;  %s1101_s24 = smov 0  }
   0xc   :  { %s1103_s25 = smov 0   ;;  %s1105_s26 = smov 0  }
   0xd LB: > { %1436 = sst [smem:[#allocation15_spill]] %s1027_s21  ;;  %s1126_s27 = sadd.s32 4294967295, %s1047_s26   ;;  %s1047_s26 = sphi %s1105_s26, %s28_s26   ;;  %s1043_s25 = sphi %s1103_s25, %s1465_s25   ;;  %s1039_s24 = sphi %s1101_s24, %s1464_s24   ;;  %s1035_s23 = sphi %s1099_s23, %s1463_s23   ;;  %s1031_s22 = sphi %s1097_s22, %s1467_s22   ;;  %s1027_s21 = sphi %s1095_s21, %s1466_s21  }
   0xe   : > { %1437 = sst [smem:[#allocation16_spill]] %s1035_s23  ;;  %s701_s28 = sadd.s32 4294967294, %s1047_s26  }
   0xf   : > { %1438 = sst [smem:[#allocation17_spill]] %s1043_s25  ;;  %s40_s29 = sadd.s32 1, %s1043_s25 }
  0x10   : > { %s49_s30 = sadd.s32 1, %s1035_s23  ;;  %p42_p0 = scmp.ge.s32.totalorder %s40_s29, 2 }
  0x11   : > { %p56_p1 = scmp.ne.s32.totalorder %s1035_s23, %s1031_s22  ;;  %p57_p2 = scmp.eq.s32.totalorder %s1047_s26, 0 }
  0x12   : > { %p62_p3 = scmp.ne.s32.totalorder %s1031_s22, %s1027_s21  ;;  %s1469_s29 = smov (%p42_p0, %s40_s29), 0 }
  0x13   : > { %1439 = sst [smem:[#allocation18_spill]] %s1469_s29  ;;  %p1138_p4 = por %p57_p2, %p56_p1 }
  0x14   : > { %p63_p5 = scmp.eq.s32.totalorder %s1126_s27, 0  ;;  %s44_s8 = ssub.s32 %s1043_s25, %s1469_s29 }
  0x15   : > { %p218_p6 = scmp.eq.s32.totalorder %s1126_s27, 1  ;;  %p47_p7 = scmp.eq.s32.totalorder %s44_s8, 0 }
  0x16   : > { %p1146_p8 = por %p63_p5, %p62_p3  ;;  %p224_p10 = scmp.eq.s32.totalorder %s701_s28, 1 }
  0x17   : > { %p1150_p9 = por %p218_p6, %p56_p1  ;;  %p777_p13 = scmp.lt.s32.totalorder %s1047_s26, 2 }
  0x18   : > { %s1441_s9 = scalar_select %p1146_p8, 1, 0 }
  0x19   : > { %s1442_s10 = scalar_select %p1150_p9, 1, 0 }
  0x1a   : > { %s1155_s11 = scalar_select %p47_p7, %s1035_s23, %s49_s30  }
  0x1b   : > { %p1157_p11 = por %p224_p10, %p62_p3  ;;  %s1164_s13 = sand.u32 1, %s1035_s23  }
  0x1c   : > { %1443 = sst [smem:[#allocation19_spill]] %s1155_s11  ;;  %s1167_s14 = sshll.u32 %s1164_s13, 3 }
  0x1d   : > { %s1444_s12 = scalar_select %p1157_p11, 1, 0 }
  0x1e   : > { %p1171_p0 = pnand %p777_p13, %p1138_p4  ;;  %s272_s16 = sand.u32 1, %s1047_s26  }
  0x1f   : > { %1445 = sst [smem:[#allocation20_spill]] %s1444_s12  ;;  %s1177_s17 = smul.u32 384, %s1043_s25 }
  0x20   : > { %s276_s18 = scalar_lea.vmem [#allocation5], %s1167_s14  ;;  %s1447_s1 = sld [smem:[#allocation22_spill]] }
  0x21   : > { %s284_s19 = sshll.u32 %s276_s18, 4  ;;  %s1189_s7 = scalar_lea.sflag [#allocation6], %s272_s16  ;;  %s1180_s19 = int_to_ptr.vmem [resolvable:$true] %s284_s19 }
  0x22   : > { %p1195_p3 = pneg %p1171_p0 }
  0x26   : > { %s1186_s30 = scalar_lea.hbm %s1447_s1, %s1177_s17  ;;  %s840_s28 = scalar_lea.hbm %s1447_s1, 768 }
  0x27   : > { %s835_s8 = scalar_lea.hbm %s1186_s30, 128  ;;  %p841_p6 = scmp.lt.u32.totalorder %s1186_s30, %s1447_s1 }
  0x28   : > { %p836_p2 = scmp.ne.s32.totalorder %s1186_s30, %s835_s8  ;;  %p842_p7 = scmp.lt.u32.totalorder %s840_s28, %s835_s8 }
  0x29   : > { %p844_p13 = scmp.lt.u32.totalorder %s835_s8, %s1186_s30 }
  0x2a   : > { %p838_p4 = pnand %p1195_p3, %p836_p2  ;;  %p843_p10 = por %p842_p7, %p841_p6 }
  0x2c   : > { %p839_p5 = pneg %p838_p4  ;;  %p845_p12 = por %p844_p13, %p843_p10 }
  0x2e   : > { %p846_p1 = pnand %p845_p12, %p839_p5 }
  0x30   : > { %849 = shalt.err (!%p846_p1)
}
  0x31   : > { %s850_s16 = scalar_lea.vmem %s1180_s19, 128  ;;  %s1049_s18 = smov [#allocation5]  }
  0x32   : > { %p851_p2 = scmp.ne.s32.totalorder %s1180_s19, %s850_s16  ;;  %s855_s20 = sshll.u32 %s1049_s18, 4  ;;  %s856_s20 = int_to_ptr.vmem [resolvable:$false] %s855_s20 }
  0x33   : > { %s857_s23 = scalar_lea.vmem %s856_s20, 256  ;;  %p858_p9 = scmp.lt.s32.totalorder %s1180_s19, %s856_s20 }
  0x34   : > { %p853_p4 = pnand %p851_p2, %p1195_p3  ;;  %p859_p8 = scmp.lt.s32.totalorder %s857_s23, %s850_s16 }
  0x36   : > { %p854_p11 = pneg %p853_p4  ;;  %p860_p6 = por %p859_p8, %p858_p9 }
  0x38   : > { %p861_p7 = pnand %p860_p6, %p854_p11 }
  0x3a   : > { %864 = shalt.err (!%p861_p7)
}
  0x3b   : > { %s1427_s11 = smov 192   ;;  %s1429_s8 = smov 64  }
  0x3c   : > { %s1431_s28 = smov 4   ;;  %p338_p8 = scmp.lt.s32.totalorder %s1047_s26, 3 }
  0x3d   : > { %766 = dma.hbm_to_vmem [thread:$0]  (!%p1171_p0), %s1186_s30, 128, %s1180_s19, %s1189_s7, %s1427_s11, %s1429_s8, %s1431_s28  }
  0x3e   : > { %p1449_p9 = scmp.ge.s32.totalorder %s1047_s26, 1  ;;  %s728_s18 = sshll.u32 %s1043_s25, 7 }
  0x3f   : > { %s254_s20 = scalar_lea.vmem [#allocation2], %s1167_s14  ;;  %s1451_s0 = sld [smem:[#allocation21_spill]] }
  0x40   : > { %p1225_p11 = pnand %p1449_p9, %p338_p8  ;;  %s262_s23 = sshll.u32 %s254_s20, 4  ;;  %s1236_s23 = int_to_ptr.vmem [resolvable:$true] %s262_s23 }
  0x41   : > { %s251_s19 = scalar_lea.sflag [#allocation3], %s1164_s13 }
  0x42   : > { %s1450_s16 = scalar_select %p1225_p11, 1, 0 }
  0x45   : > { %s1234_s21 = scalar_lea.hbm %s1451_s0, %s728_s18  ;;  %s870_s20 = scalar_lea.hbm %s1451_s0, 256 }
  0x46   : > { %s865_s30 = scalar_lea.hbm %s1234_s21, 128  ;;  %p871_p10 = scmp.lt.u32.totalorder %s1234_s21, %s1451_s0 }
  0x47   : > { %p866_p12 = scmp.ne.s32.totalorder %s1234_s21, %s865_s30  ;;  %p872_p13 = scmp.lt.u32.totalorder %s870_s20, %s865_s30 }
  0x48   : > { %p874_p4 = scmp.lt.u32.totalorder %s865_s30, %s1234_s21 }
  0x49   : > { %p868_p1 = pnand %p866_p12, %p1195_p3  ;;  %p873_p2 = por %p872_p13, %p871_p10 }
  0x4b   : > { %p869_p5 = pneg %p868_p1  ;;  %p875_p6 = por %p874_p4, %p873_p2 }
  0x4d   : > { %p876_p7 = pnand %p875_p6, %p869_p5 }
  0x4f   : > { %879 = shalt.err (!%p876_p7)
}
  0x50   : > { %s880_s12 = scalar_lea.vmem %s1236_s23, 128  ;;  %s1053_s11 = smov [#allocation2]  }
  0x51   : > { %p881_p8 = scmp.ne.s32.totalorder %s1236_s23, %s880_s12  ;;  %s885_s8 = sshll.u32 %s1053_s11, 4  ;;  %s886_s8 = int_to_ptr.vmem [resolvable:$false] %s885_s8 }
  0x52   : > { %s887_s28 = scalar_lea.vmem %s886_s8, 256  ;;  %p888_p1 = scmp.lt.s32.totalorder %s1236_s23, %s886_s8 }
  0x53   : > { %p883_p9 = pnand %p881_p8, %p1195_p3  ;;  %p889_p11 = scmp.lt.s32.totalorder %s887_s28, %s880_s12 }
  0x55   : > { %p884_p12 = pneg %p883_p9  ;;  %p890_p10 = por %p889_p11, %p888_p1 }
  0x57   : > { %p891_p13 = pnand %p890_p10, %p884_p12 }
  0x59   : > { %894 = shalt.err (!%p891_p13)
}
  0x5a   : > { %s1452_s18 = smov 4   ;;  %s1453_s30 = smov 64  }
  0x5b   : > { %763 = dma.hbm_to_vmem [thread:$0]  (!%p1171_p0), %s1234_s21, 128, %s1236_s23, %s251_s19, %s1453_s30, %s1453_s30, %s1452_s18  }
  0x5c   : > { %s595_s12 = scalar_lea.hbm %s1416_s2, %s1177_s17  ;;  %s298_s8 = scalar_lea.vmem [#allocation7], %s1167_s14 }
  0x5d   : > { %s1269_s11 = scalar_lea.hbm %s595_s12, 64  ;;  %s307_s28 = sshll.u32 %s298_s8, 4  ;;  %s1272_s28 = int_to_ptr.vmem [resolvable:$true] %s307_s28 }
  0x5e   : > { %s925_s0 = scalar_lea.hbm %s595_s12, 192  ;;  %s900_s23 = scalar_lea.hbm %s1416_s2, 768 }
  0x5f   : > { %p896_p11 = scmp.ne.s32.totalorder %s1269_s11, %s925_s0  ;;  %p901_p4 = scmp.lt.u32.totalorder %s1269_s11, %s1416_s2 }
  0x60   : > { %p902_p6 = scmp.lt.u32.totalorder %s900_s23, %s925_s0  ;;  %p904_p8 = scmp.lt.u32.totalorder %s925_s0, %s1269_s11 }
  0x61   : > { %p898_p5 = pnand %p896_p11, %p1195_p3 }
  0x62   : > { %p903_p7 = por %p902_p6, %p901_p4 }
  0x63   : > { %p899_p2 = pneg %p898_p5 }
  0x64   : > { %p905_p9 = por %p904_p8, %p903_p7 }
  0x66   : > { %p906_p12 = pnand %p905_p9, %p899_p2 }
  0x68   : > { %909 = shalt.err (!%p906_p12)
}
  0x69   : > { %s910_s1 = scalar_lea.vmem %s1272_s28, 128  ;;  %s1054_s25 = smov [#allocation7]  }
  0x6a   : > { %p911_p1 = scmp.ne.s32.totalorder %s1272_s28, %s910_s1  ;;  %s915_s12 = sshll.u32 %s1054_s25, 4  ;;  %s916_s12 = int_to_ptr.vmem [resolvable:$false] %s915_s12 }
  0x6b   : > { %s917_s8 = scalar_lea.vmem %s916_s12, 256  ;;  %p918_p11 = scmp.lt.s32.totalorder %s1272_s28, %s916_s12 }
  0x6c   : > { %p913_p10 = pnand %p911_p1, %p1195_p3  ;;  %p919_p5 = scmp.lt.s32.totalorder %s917_s8, %s910_s1 }
  0x6e   : > { %p914_p13 = pneg %p913_p10  ;;  %p920_p4 = por %p919_p5, %p918_p11 }
  0x70   : > { %p921_p6 = pnand %p920_p4, %p914_p13 }
  0x72   : > { %924 = shalt.err (!%p921_p6)
}
  0x73   : > { %s1454_s0 = smov 192   ;;  %s603_s19 = scalar_lea.hbm %s1417_s3, %s1177_s17 }
  0x74   : > { %769 = dma.hbm_to_vmem [thread:$0]  (!%p1171_p0), %s1269_s11, 128, %s1272_s28, %s1189_s7, %s1454_s0, %s1453_s30, %s1452_s18  }
  0x75   : > { %s1302_s20 = scalar_lea.hbm %s603_s19, 128  ;;  %s321_s1 = scalar_lea.vmem [#allocation8], %s1167_s14 }
  0x76   : > { %s330_s25 = sshll.u32 %s321_s1, 4  ;;  %s318_s12 = scalar_lea.sflag [#allocation9], %s1164_s13  ;;  %s1305_s25 = int_to_ptr.vmem [resolvable:$true] %s330_s25 }
  0x77   : > { %s956_s8 = scalar_lea.hbm %s603_s19, 256  ;;  %s931_s28 = scalar_lea.hbm %s1417_s3, 768 }
  0x78   : > { %p927_p2 = scmp.ne.s32.totalorder %s1302_s20, %s956_s8  ;;  %p932_p9 = scmp.lt.u32.totalorder %s1302_s20, %s1417_s3 }
  0x79   : > { %p933_p12 = scmp.lt.u32.totalorder %s931_s28, %s956_s8  ;;  %p935_p10 = scmp.lt.u32.totalorder %s956_s8, %s1302_s20 }
  0x7a   : > { %p929_p7 = pnand %p927_p2, %p1195_p3 }
  0x7b   : > { %p934_p1 = por %p933_p12, %p932_p9 }
  0x7c   : > { %p930_p8 = pneg %p929_p7 }
  0x7d   : > { %p936_p13 = por %p935_p10, %p934_p1 }
  0x7f   : > { %p937_p11 = pnand %p936_p13, %p930_p8 }
  0x81   : > { %940 = shalt.err (!%p937_p11)
}
  0x82   : > { %s941_s14 = scalar_lea.vmem %s1305_s25, 128  ;;  %s1055_s23 = smov [#allocation8]  }
  0x83   : > { %p942_p5 = scmp.ne.s32.totalorder %s1305_s25, %s941_s14  ;;  %s946_s19 = sshll.u32 %s1055_s23, 4  ;;  %s947_s19 = int_to_ptr.vmem [resolvable:$false] %s946_s19 }
  0x84   : > { %s948_s1 = scalar_lea.vmem %s947_s19, 256  ;;  %p949_p2 = scmp.lt.s32.totalorder %s1305_s25, %s947_s19 }
  0x85   : > { %p944_p4 = pnand %p942_p5, %p1195_p3  ;;  %p950_p7 = scmp.lt.s32.totalorder %s948_s1, %s941_s14 }
  0x87   : > { %p945_p6 = pneg %p944_p4  ;;  %p951_p9 = por %p950_p7, %p949_p2 }
  0x89   : > { %p952_p12 = pnand %p951_p9, %p945_p6 }
  0x8b   : > { %955 = shalt.err (!%p952_p12)
}
  0x8c   : > { %772 = dma.hbm_to_vmem [thread:$0]  (!%p1171_p0), %s1302_s20, 128, %s1305_s25, %s318_s12, %s1454_s0, %s1453_s30, %s1452_s18  }
  0x8d   : > { %p1455_p3 = scmp.ne.s32.totalorder %s1450_s16, 0 }
  0x8e   : > { %s1336_s29 = sand.u32 (!%p1455_p3), 1, %s1031_s22   ;;  %p1456_p8 = scmp.ne.s32.totalorder (!%p1455_p3), %s1441_s9, 0 }
  0x8f   : > { %342 = sbr.rel (%p1455_p3) target bundleno = 413 (0x19d), region = 44  ;;  %s714_s8 = sshll.u32 (!%p1455_p3), %s1336_s29, 3 }
  0x90   : > { %s345_s7 = scalar_lea.sflag (!%p1455_p3), [#allocation3], %s1336_s29  ;;  %s348_s15 = scalar_lea.vmem (!%p1455_p3), [#allocation2], %s714_s8 }
  0x96   : > { %1010 = dma.done.wait (%p1456_p8), %s345_s7, 128  }
  0x97   : > { %1012 = vsyncadd (%p1456_p8), %s345_s7, 4294967168  ;;  %s353_s13 = sand.u32 1, %s1126_s27   ;;  %s357_s16 = scalar_lea.vmem [#allocation5], %s714_s8 }
  0x98   : > { %s354_s18 = scalar_lea.sflag [#allocation6], %s353_s13 }
  0x99   : > { %1014 = dma.done.wait (%p1456_p8), %s354_s18, 256  }
  0x9a   : > { %1016 = vsyncadd (%p1456_p8), %s354_s18, 4294967040  ;;  %s366_s30 = scalar_lea.vmem [#allocation7], %s714_s8  ;;  %s372_s0 = scalar_lea.sflag [#allocation9], %s1336_s29 }
  0x9b   : > { %s375_s20 = scalar_lea.vmem [#allocation8], %s714_s8 }
  0x9c   : > { %1018 = dma.done.wait (%p1456_p8), %s372_s0, 128  }
  0x9d   : > { %1020 = vsyncadd (%p1456_p8), %s372_s0, 4294967168  ;;  %v1056_v0 = vmov 0.0   ;;  %vm1057_vm0 = vmmov 0   ;;  %v1058_v1 = vmov 0   ;;  %v834_v2 = vld [vmem:[%s348_s15] sm:$0xff]   ;;  %vm484_vm1 = vcmask 654336  }
  0x9e   : > { %735 = vmatprep.subr.bf16.mxu0 %v1056_v0  ;;  %745 = vmatprep.mubr.msk.bf16.mxu0 %vm1057_vm0, %v1056_v0  ;;  %v422_v3 = vld [vmem:[%s357_s16] sm:$0xf]  ;;  %v423_v4 = vld [vmem:[%s357_s16 + $0x4] sm:$0xf]  ;;  %v424_v5 = vld [vmem:[%s366_s30] sm:$0xf] }
  0x9f   : > { %833 = vset.pattern.permute.xlu0 %v1058_v1  ;;  %736 = vmatpush3.bf16.msra.mxu0 %v834_v2  ;;  %v425_v6 = vld [vmem:[%s366_s30 + $0x4] sm:$0xf]  ;;  %v426_v7 = vld [vmem:[%s375_s20] sm:$0xf]  ;;  %v427_v8 = vld [vmem:[%s375_s20 + $0x4] sm:$0xf]  ;;  %v428_v9 = vunpack.c.l.bf16 %v422_v3  ;;  %v429_v10 = vunpack.c.l.bf16 %v423_v4  ;;  %v430_v11 = vunpack.c.l.bf16 %v424_v5  ;;  %v439_v12 = vmin.bf16 %v424_v5, %v422_v3 }
  0xa0   : > { %737 = vmatprep.subr.bf16.mxu0 %v1056_v0  ;;  %v431_v13 = vunpack.c.l.bf16 %v425_v6  ;;  %v434_v14 = vunpack.c.l.bf16 %v426_v7  ;;  %v435_v15 = vunpack.c.l.bf16 %v427_v8  ;;  %v440_v16 = vmin.bf16 %v425_v6, %v423_v4  ;;  %v478_v17 = vld [vmem:[%s1419_s5] sm:$0xff]  ;;  %s718_s11 = sshll.u32 %s1336_s29, 2  ;;  %s725_s28 = sshll.u32 %s1039_s24, 6 }
  0xa1   : > { %v432_v18 = vadd.f32 %v430_v11, %v428_v9  ;;  %v443_v19 = vmax.bf16 %v424_v5, %v422_v3  ;;  %v444_v20 = vmax.bf16 %v425_v6, %v423_v4  ;;  %481 = vperm.xlu0 %833, %v478_v17   ;;  %v441_v23 = vmin.bf16 %v439_v12, %v426_v7  ;;  %v477_v36 = vld [vmem:[%s1418_s4] sm:$0xf]  ;;  %s418_s17 = scalar_lea.vmem [#allocation10], %s718_s11  ;;  %s1365_s19 = scalar_lea.hbm %s1420_s6, %s725_s28 }
  0xa2   : > { %v433_v21 = vadd.f32 %v431_v13, %v429_v10  ;;  %v442_v25 = vmin.bf16 %v440_v16, %v427_v8  ;;  %s545_s21 = sshll.u32 %s418_s17, 4  ;;  %s531_s1 = scalar_lea.sflag [#allocation4], %s1336_s29  ;;  %s1367_s21 = int_to_ptr.vmem [resolvable:$true] %s545_s21 }
  0xa3   : > { %v436_v22 = vadd.f32 %v434_v14, %v432_v18  ;;  %v447_v26 = vmin.bf16 %v443_v19, %v426_v7  ;;  %v448_v27 = vmin.bf16 %v444_v20, %v427_v8  ;;  %v445_v33 = vmax.bf16 %v443_v19, %v426_v7  ;;  %s957_s24 = scalar_lea.vmem %s1367_s21, 64  ;;  %p1457_p1 = scmp.ne.s32.totalorder %s1442_s10, 0 }
  0xa4   : > { %v437_v24 = vadd.f32 %v435_v15, %v433_v21  ;;  %v720_v29 = vcombine.low %v441_v23, %v442_v25  ;;  %v446_v34 = vmax.bf16 %v444_v20, %v427_v8  ;;  %p958_p0 = scmp.ne.s32.totalorder %s1367_s21, %s957_s24  ;;  %s1059_s8 = smov [#allocation10]  }
  0xa5   : > { %v449_v30 = vmax.bf16 %v447_v26, %v439_v12  ;;  %v450_v31 = vmax.bf16 %v448_v27, %v440_v16  ;;  %s961_s7 = sshll.u32 %s1059_s8, 4  ;;  %s962_s7 = int_to_ptr.vmem [resolvable:$false] %s961_s7 }
  0xa6   : > { %v438_v28 = vpack.c.bf16 %v437_v24, %v436_v22  ;;  %v722_v35 = vcombine.low %v445_v33, %v446_v34  ;;  %p959_p10 = pnand %p958_p0, %p1457_p1  ;;  %s963_s15 = scalar_lea.vmem %s962_s7, 128 }
  0xa7   : > { %v721_v32 = vcombine.low %v449_v30, %v450_v31  ;;  %p964_p11 = scmp.lt.s32.totalorder %s1367_s21, %s962_s7  ;;  %p965_p5 = scmp.lt.s32.totalorder %s963_s15, %s957_s24 }
  0xa8   : > { %738 = vmatpush3.bf16.msra.mxu0 %v438_v28  ;;  %p960_p13 = pneg %p959_p10 }
  0xa9   : > { %739 = vmatprep.subr.bf16.mxu0 %v1056_v0  ;;  %p966_p4 = por %p965_p5, %p964_p11 }
  0xab   : > { %p967_p6 = pnand %p966_p4, %p960_p13 }
  0xac   : > { %740 = vmatpush3.bf16.msra.mxu0 %v720_v29 }
  0xad   : > { %741 = vmatprep.subr.bf16.mxu0 %v1056_v0 }
  0xb0   : > { %742 = vmatpush3.bf16.msra.mxu0 %v721_v32 }
  0xb1   : > { %743 = vmatprep.subr.bf16.mxu0 %v1056_v0 }
  0xb4   : > { %744 = vmatpush3.bf16.msra.mxu0 %v722_v35 }
  0xb7   : > { %746 = vmatmul.mubr.msk.bf16.vlgmr.msra.gmra.mrb[0].mxu0 %vm484_vm1, %v477_v36 }
 0x120   : > { %v482_v37 = vpop.permute.xlu0 %481 }
 0x18a   : > { %v522_v38 = vpop.f32.mrb[0].mxu0 }
 0x18b   : > { %v523_v39 = vadd.f32 %v522_v38, %v482_v37  ;;  %v747_v40 = vpop.f32.mrb[1].mxu0 }
 0x18c   : > { %v525_v41 = vpop.f32.mrb[2].mxu0 }
 0x18d   : > { %v528_v42 = vpack.c.bf16 %v523_v39, %v523_v39  ;;  %v748_v43 = vpop.f32.mrb[3].mxu0 }
 0x18f   : > { %529 = vst [vmem:[%s418_s17] sm:$0xf] %v528_v42 }
 0x190   : > { %970 = shalt.err (!%p967_p6)
}
 0x191   : > { %s971_s29 = scalar_lea.hbm %s1365_s19, 64  ;;  %s975_s16 = scalar_lea.hbm %s1420_s6, 128 }
 0x192   : > { %p972_p2 = scmp.ne.s32.totalorder %s1365_s19, %s971_s29  ;;  %p976_p12 = scmp.lt.u32.totalorder %s1365_s19, %s1420_s6 }
 0x193   : > { %p977_p3 = scmp.lt.u32.totalorder %s975_s16, %s971_s29  ;;  %p979_p0 = scmp.lt.u32.totalorder %s971_s29, %s1365_s19 }
 0x194   : > { %p973_p7 = pnand %p972_p2, %p1457_p1 }
 0x195   : > { %p978_p8 = por %p977_p3, %p976_p12 }
 0x196   : > { %p974_p9 = pneg %p973_p7 }
 0x197   : > { %p980_p10 = por %p979_p0, %p978_p8 }
 0x199   : > { %p981_p13 = pnand %p980_p10, %p974_p9 }
 0x19b   : > { %984 = shalt.err (!%p981_p13)
}
 0x19c   : > { %758 = dma.vmem_to_hbm [thread:$0]  (%p1457_p1), %s1367_s21, 64, %s1365_s19, %s531_s1  }
 0x19d PF: > { %s1458_s20 = sld [smem:[#allocation15_spill]]  ;;  %s1459_s27 = sld [smem:[#allocation20_spill]] }
 0x19e   : > { %p1461_p5 = scmp.ge.s32.totalorder %s1047_s26, 2 }
 0x1a3   : > { %s557_s9 = sand.u32 1, %s1458_s20   ;;  %p1460_p11 = scmp.ne.s32.totalorder %s1459_s27, 0 }
 0x1a4   : > { %s558_s25 = scalar_lea.sflag [#allocation4], %s557_s9 }
 0x1a5   : > { %p774_p4 = pnand %p1461_p5, %p1460_p11 }
 0x1a7   : > { %1022 = dma.done.wait (!%p774_p4), %s558_s25, 64  }
 0x1a8   : > { %1024 = vsyncadd (!%p774_p4), %s558_s25, 4294967232  ;;  %s28_s26 = sadd.s32 1, %s1047_s26   ;;  %s1462_s12 = sld [smem:[#allocation16_spill]] }
 0x1a9   : > { %p25_p6 = scmp.ge.s32.totalorder %s28_s26, 4   ;;  %s1463_s23 = sld [smem:[#allocation19_spill]] }
 0x1aa   : > { %s1464_s24 = sld [smem:[#allocation17_spill]]  ;;  %s1465_s25 = sld [smem:[#allocation18_spill]] }
 0x1ab   : > { %s1466_s21 = smov %s1031_s22  ;;  %27 = sbr.rel (!%p25_p6) target bundleno = 13 (0xd), region = 126 }
 0x1ae   : > { %s1467_s22 = smov %s1462_s12 }
 0x1b2   :  { %563 = vsyncpa [#allocation3], 1 }
 0x1b3   :  { %565 = vsyncpa [#allocation3 + $0x1], 1 }
 0x1b4   :  { %566 = vsyncpa [#allocation6], 1 }
 0x1b5   :  { %568 = vsyncpa [#allocation6 + $0x1], 1 }
 0x1b6   :  { %569 = vsyncpa [#allocation9], 1 }
 0x1b7   :  { %571 = vsyncpa [#allocation9 + $0x1], 1 }
 0x1b8   :  { %572 = vsyncpa [#allocation4], 1 }
 0x1b9   :  { %574 = vsyncpa [#allocation4 + $0x1], 1 }

</bundles_post_ra>
